<compile_context>
chip_gen: v7x
topology: tpu7x:2x2x1
jax: 0.10.0
libtpu: 0.0.40
codegen_flags: <defaults>
</compile_context>

<pallas_src>
import jax
import jax.numpy as jnp
from jax.experimental import pallas as pl
from jax.experimental.pallas import tpu as pltpu

CIN = 128
COUT = 5
K = 7
L = 10
STRIDE = 1
PADDING = 3
OUTPUT_PADDING = 2
L_OUT = (L - 1) * STRIDE - 2 * PADDING + (K - 1) + OUTPUT_PADDING + 1  # 12

LEFT = K - 1 - PADDING                      # 3
RIGHT = K - 1 - PADDING + OUTPUT_PADDING    # 5
L_PAD = L + LEFT + RIGHT                    # 18 == L_OUT + K - 1


def _convt1d_tanh_kernel(x_ref, w_ref, b_ref, out_ref, xpad_ref):
    """
    x_ref:    (1, CIN, L)      = (1, 128, 10)   activation, native layout
    w_ref:    (K, COUT, CIN)   = (7, 5, 128)    flipped, lane-dense per-tap weights
    b_ref:    (COUT, 1)        = (5, 1)
    out_ref:  (1, COUT, L_OUT) = (1, 5, 12)     PyTorch layout, written directly
    xpad_ref: (CIN, L_PAD)     = (128, 18)      zero-padded activation (VMEM scratch)

    out[co, o] = tanh(b[co] + sum_{j, ci} xpad[ci, o + j] * w_ref[j, co, ci])
    with w_ref[j, co, ci] = w[ci, co, K-1-j]  (spatial flip baked into the weight).
    """
    # In-kernel zero padding along the lane (length) axis — no wrapper-side pad.
    xpad_ref[...] = jnp.zeros_like(xpad_ref)
    xpad_ref[:, LEFT:LEFT + L] = x_ref[0]
    xp = xpad_ref[...]                                                # (128, 18)

    acc = jnp.zeros((COUT, L_OUT), jnp.float32)
    for j in range(K):                       # unrolled: 7 small MXU contractions
        y = jnp.dot(w_ref[j], xp, preferred_element_type=jnp.float32)  # (5, 18)
        acc = acc + y[:, j:j + L_OUT]        # single-vreg static lane slice
    out_ref[0] = jnp.tanh(acc + b_ref[...])


def prepare_params(w, b):
    """Hoisted, call once per weight set.
    w: (CIN, COUT, K), b: (COUT,) ->
      w_taps: (K, COUT, CIN) with w_taps[j, co, ci] = w[ci, co, K-1-j]
      bias2:  (COUT, 1)"""
    w_taps = jnp.transpose(w[:, :, ::-1], (2, 1, 0))   # (K, COUT, CIN), lane-dense
    return w_taps, b.reshape(COUT, 1)


@jax.jit
def conv_transpose1d_tanh(x, w_taps, bias2):
    """x: (1, CIN, L) f32, w_taps: (K, COUT, CIN) f32, bias2: (COUT, 1) f32
    Returns (1, COUT, L_OUT) f32 == tanh(conv_transpose1d(x, w, b,
    stride=1, padding=3, output_padding=2)).  No pre/post XLA ops: the kernel
    reads x natively and writes the PyTorch output layout directly."""
    return pl.pallas_call(
        _convt1d_tanh_kernel,
        out_shape=jax.ShapeDtypeStruct((1, COUT, L_OUT), jnp.float32),
        in_specs=[
            pl.BlockSpec(memory_space=pltpu.MemorySpace.VMEM),   # x      (1, 128, 10)
            pl.BlockSpec(memory_space=pltpu.MemorySpace.VMEM),   # w_taps (7, 5, 128)
            pl.BlockSpec(memory_space=pltpu.MemorySpace.VMEM),   # bias   (5, 1)
        ],
        out_specs=pl.BlockSpec(memory_space=pltpu.MemorySpace.VMEM),
        scratch_shapes=[pltpu.VMEM((CIN, L_PAD), jnp.float32)],  # padded activation
        cost_estimate=pl.CostEstimate(
            flops=2 * K * COUT * CIN * L_PAD,       # ~161 KFLOP of MXU work
            transcendentals=COUT * L_OUT,           # 60 tanh
            bytes_accessed=(CIN * L + K * COUT * CIN + COUT + COUT * L_OUT) * 4,
        ),
    )(x, w_taps, bias2)


def _reference(x, w, b):
    """Pure-JAX reference: explicit scatter form of conv_transpose1d + tanh."""
    out = jnp.zeros((COUT, L_OUT), jnp.float32) + b[:, None]
    xs = x[0]  # (CIN, L)
    for i in range(L):
        for k in range(K):
            o = i * STRIDE - PADDING + k
            if 0 <= o < L_OUT:
                out = out.at[:, o].add(xs[:, i] @ w[:, :, k])
    return jnp.tanh(out)[None]


if __name__ == "__main__":
    key = jax.random.PRNGKey(0)
    kx, kw, kb = jax.random.split(key, 3)

    # Input matching the module's example: (1, 128, 10)
    x1 = jax.random.normal(kx, (1, CIN, L), dtype=jnp.float32)

    # Deterministic ConvTranspose2d(128, 5, 7)-style init: weight (128,5,7,7),
    # bias (5,), uniform(-s, s).  The 1-D kernel is the first kernel column.
    s = 1.0 / (CIN * K * K) ** 0.5
    w2d = jax.random.uniform(kw, (CIN, COUT, K, K), jnp.float32, -s, s)
    bias = jax.random.uniform(kb, (COUT,), jnp.float32, -s, s)
    w1d = w2d[:, :, 0, :]                                    # (128, 5, 7)

    # Parameter prep is hoisted out of the per-call path.
    w_taps, bias2 = prepare_params(w1d, bias)
    w_taps = jax.block_until_ready(w_taps)
    bias2 = jax.block_until_ready(bias2)

    out = conv_transpose1d_tanh(x1, w_taps, bias2)
    jax.block_until_ready(out)

    assert out.shape == (1, COUT, L_OUT), out.shape
    ref = _reference(x1, w1d, bias)
    assert jnp.allclose(out, ref, atol=1e-5, rtol=1e-5)

    print("KERNEL_OK")
</pallas_src>

<mosaic_0001>
module attributes {stable_mosaic.version = 11 : i64} {
  func.func @_convt1d_tanh_kernel(%arg0: memref<1x128x10xf32, #tpu.memory_space<vmem>>, %arg1: memref<7x5x128xf32, #tpu.memory_space<vmem>>, %arg2: memref<5x1xf32, #tpu.memory_space<vmem>>, %arg3: memref<1x5x12xf32, #tpu.memory_space<vmem>>, %arg4: memref<128x18xf32, #tpu.memory_space<vmem>>) attributes {dimension_semantics = [], scalar_prefetch = 0 : i64, scratch_operands = 1 : i64, tpu.core_type = #tpu.core_type<tc>} {
    %cst = arith.constant 0.000000e+00 : f32
    %0 = vector.broadcast %cst : f32 to vector<128x18xf32>
    %c0 = arith.constant 0 : index
    %c0_0 = arith.constant 0 : index
    %1 = vector.load %arg4[%c0, %c0_0] : memref<128x18xf32, #tpu.memory_space<vmem>>, vector<128x18xf32>
    tpu.vector_store %arg4[%c0, %c0_0], %0 {strides = array<i32>} : memref<128x18xf32, #tpu.memory_space<vmem>>, vector<128x18xf32>,
    %c0_1 = arith.constant 0 : index
    %c0_2 = arith.constant 0 : index
    %c0_3 = arith.constant 0 : index
    %2 = vector.load %arg0[%c0_1, %c0_2, %c0_3] : memref<1x128x10xf32, #tpu.memory_space<vmem>>, vector<1x128x10xf32>
    %3 = vector.shape_cast %2 : vector<1x128x10xf32> to vector<128x10xf32>
    %c0_4 = arith.constant 0 : index
    %c3 = arith.constant 3 : index
    %4 = vector.load %arg4[%c0_4, %c3] : memref<128x18xf32, #tpu.memory_space<vmem>>, vector<128x10xf32>
    tpu.vector_store %arg4[%c0_4, %c3], %3 {strides = array<i32>} : memref<128x18xf32, #tpu.memory_space<vmem>>, vector<128x10xf32>,
    %c0_5 = arith.constant 0 : index
    %c0_6 = arith.constant 0 : index
    %5 = vector.load %arg4[%c0_5, %c0_6] : memref<128x18xf32, #tpu.memory_space<vmem>>, vector<128x18xf32>
    %cst_7 = arith.constant 0.000000e+00 : f32
    %6 = vector.broadcast %cst_7 : f32 to vector<5x12xf32>
    %c0_8 = arith.constant 0 : index
    %c0_9 = arith.constant 0 : index
    %c0_10 = arith.constant 0 : index
    %7 = vector.load %arg1[%c0_8, %c0_9, %c0_10] : memref<7x5x128xf32, #tpu.memory_space<vmem>>, vector<1x5x128xf32>
    %8 = vector.shape_cast %7 : vector<1x5x128xf32> to vector<5x128xf32>
    %cst_11 = arith.constant dense<0.000000e+00> : vector<5x18xf32>
    %9 = tpu.matmul %8, %5, %cst_11 {dimension_numbers = #tpu.dot_dimension_numbers<[1], [0], [0], [1], [0, 0, 1, 1], [], []>} : vector<5x128xf32>, vector<128x18xf32>, vector<5x18xf32> -> vector<5x18xf32>
    %10 = vector.extract_strided_slice %9 {offsets = [0, 0], sizes = [5, 12], strides = [1, 1]} : vector<5x18xf32> to vector<5x12xf32>
    %11 = arith.addf %6, %10 : vector<5x12xf32>
    %c1 = arith.constant 1 : index
    %c0_12 = arith.constant 0 : index
    %c0_13 = arith.constant 0 : index
    %12 = vector.load %arg1[%c1, %c0_12, %c0_13] : memref<7x5x128xf32, #tpu.memory_space<vmem>>, vector<1x5x128xf32>
    %13 = vector.shape_cast %12 : vector<1x5x128xf32> to vector<5x128xf32>
    %cst_14 = arith.constant dense<0.000000e+00> : vector<5x18xf32>
    %14 = tpu.matmul %13, %5, %cst_14 {dimension_numbers = #tpu.dot_dimension_numbers<[1], [0], [0], [1], [0, 0, 1, 1], [], []>} : vector<5x128xf32>, vector<128x18xf32>, vector<5x18xf32> -> vector<5x18xf32>
    %15 = vector.extract_strided_slice %14 {offsets = [0, 1], sizes = [5, 12], strides = [1, 1]} : vector<5x18xf32> to vector<5x12xf32>
    %16 = arith.addf %11, %15 : vector<5x12xf32>
    %c2 = arith.constant 2 : index
    %c0_15 = arith.constant 0 : index
    %c0_16 = arith.constant 0 : index
    %17 = vector.load %arg1[%c2, %c0_15, %c0_16] : memref<7x5x128xf32, #tpu.memory_space<vmem>>, vector<1x5x128xf32>
    %18 = vector.shape_cast %17 : vector<1x5x128xf32> to vector<5x128xf32>
    %cst_17 = arith.constant dense<0.000000e+00> : vector<5x18xf32>
    %19 = tpu.matmul %18, %5, %cst_17 {dimension_numbers = #tpu.dot_dimension_numbers<[1], [0], [0], [1], [0, 0, 1, 1], [], []>} : vector<5x128xf32>, vector<128x18xf32>, vector<5x18xf32> -> vector<5x18xf32>
    %20 = vector.extract_strided_slice %19 {offsets = [0, 2], sizes = [5, 12], strides = [1, 1]} : vector<5x18xf32> to vector<5x12xf32>
    %21 = arith.addf %16, %20 : vector<5x12xf32>
    %c3_18 = arith.constant 3 : index
    %c0_19 = arith.constant 0 : index
    %c0_20 = arith.constant 0 : index
    %22 = vector.load %arg1[%c3_18, %c0_19, %c0_20] : memref<7x5x128xf32, #tpu.memory_space<vmem>>, vector<1x5x128xf32>
    %23 = vector.shape_cast %22 : vector<1x5x128xf32> to vector<5x128xf32>
    %cst_21 = arith.constant dense<0.000000e+00> : vector<5x18xf32>
    %24 = tpu.matmul %23, %5, %cst_21 {dimension_numbers = #tpu.dot_dimension_numbers<[1], [0], [0], [1], [0, 0, 1, 1], [], []>} : vector<5x128xf32>, vector<128x18xf32>, vector<5x18xf32> -> vector<5x18xf32>
    %25 = vector.extract_strided_slice %24 {offsets = [0, 3], sizes = [5, 12], strides = [1, 1]} : vector<5x18xf32> to vector<5x12xf32>
    %26 = arith.addf %21, %25 : vector<5x12xf32>
    %c4 = arith.constant 4 : index
    %c0_22 = arith.constant 0 : index
    %c0_23 = arith.constant 0 : index
    %27 = vector.load %arg1[%c4, %c0_22, %c0_23] : memref<7x5x128xf32, #tpu.memory_space<vmem>>, vector<1x5x128xf32>
    %28 = vector.shape_cast %27 : vector<1x5x128xf32> to vector<5x128xf32>
    %cst_24 = arith.constant dense<0.000000e+00> : vector<5x18xf32>
    %29 = tpu.matmul %28, %5, %cst_24 {dimension_numbers = #tpu.dot_dimension_numbers<[1], [0], [0], [1], [0, 0, 1, 1], [], []>} : vector<5x128xf32>, vector<128x18xf32>, vector<5x18xf32> -> vector<5x18xf32>
    %30 = vector.extract_strided_slice %29 {offsets = [0, 4], sizes = [5, 12], strides = [1, 1]} : vector<5x18xf32> to vector<5x12xf32>
    %31 = arith.addf %26, %30 : vector<5x12xf32>
    %c5 = arith.constant 5 : index
    %c0_25 = arith.constant 0 : index
    %c0_26 = arith.constant 0 : index
    %32 = vector.load %arg1[%c5, %c0_25, %c0_26] : memref<7x5x128xf32, #tpu.memory_space<vmem>>, vector<1x5x128xf32>
    %33 = vector.shape_cast %32 : vector<1x5x128xf32> to vector<5x128xf32>
    %cst_27 = arith.constant dense<0.000000e+00> : vector<5x18xf32>
    %34 = tpu.matmul %33, %5, %cst_27 {dimension_numbers = #tpu.dot_dimension_numbers<[1], [0], [0], [1], [0, 0, 1, 1], [], []>} : vector<5x128xf32>, vector<128x18xf32>, vector<5x18xf32> -> vector<5x18xf32>
    %35 = vector.extract_strided_slice %34 {offsets = [0, 5], sizes = [5, 12], strides = [1, 1]} : vector<5x18xf32> to vector<5x12xf32>
    %36 = arith.addf %31, %35 : vector<5x12xf32>
    %c6 = arith.constant 6 : index
    %c0_28 = arith.constant 0 : index
    %c0_29 = arith.constant 0 : index
    %37 = vector.load %arg1[%c6, %c0_28, %c0_29] : memref<7x5x128xf32, #tpu.memory_space<vmem>>, vector<1x5x128xf32>
    %38 = vector.shape_cast %37 : vector<1x5x128xf32> to vector<5x128xf32>
    %cst_30 = arith.constant dense<0.000000e+00> : vector<5x18xf32>
    %39 = tpu.matmul %38, %5, %cst_30 {dimension_numbers = #tpu.dot_dimension_numbers<[1], [0], [0], [1], [0, 0, 1, 1], [], []>} : vector<5x128xf32>, vector<128x18xf32>, vector<5x18xf32> -> vector<5x18xf32>
    %40 = vector.extract_strided_slice %39 {offsets = [0, 6], sizes = [5, 12], strides = [1, 1]} : vector<5x18xf32> to vector<5x12xf32>
    %41 = arith.addf %36, %40 : vector<5x12xf32>
    %c0_31 = arith.constant 0 : index
    %c0_32 = arith.constant 0 : index
    %42 = vector.load %arg2[%c0_31, %c0_32] : memref<5x1xf32, #tpu.memory_space<vmem>>, vector<5x1xf32>
    %43 = vector.broadcast %42 : vector<5x1xf32> to vector<5x12xf32>
    %44 = arith.addf %41, %43 : vector<5x12xf32>
    %45 = math.tanh %44 : vector<5x12xf32>
    %c0_33 = arith.constant 0 : index
    %c0_34 = arith.constant 0 : index
    %c0_35 = arith.constant 0 : index
    %46 = vector.load %arg3[%c0_33, %c0_34, %c0_35] : memref<1x5x12xf32, #tpu.memory_space<vmem>>, vector<1x5x12xf32>
    %47 = vector.shape_cast %46 : vector<1x5x12xf32> to vector<5x12xf32>
    %48 = vector.shape_cast %45 : vector<5x12xf32> to vector<1x5x12xf32>
    tpu.vector_store %arg3[%c0_33, %c0_34, %c0_35], %48 {strides = array<i32>} : memref<1x5x12xf32, #tpu.memory_space<vmem>>, vector<1x5x12xf32>,
    return
  }
}

</mosaic_0001>

<bundles_post_ra>
// kernel: conv_transpose1d_tanh.1
= control target key start
LH: loop header
LB: loop body
LE: loop exit
PB: predicated region body
PF: predicated region fallthrough
CT: control target
= control target key end

     0   :  { %vm14_vm0 = vcmask 146432   ;;  %v1245_v2 = vmov 0.0   ;;  %v1246_v3 = vmov 0.0|0.0   ;;  %s1247_s16 = smov 3   ;;  %vm1248_vm1 = vmmov 0   ;;  %s1250_s4 = smov 127   ;;  %s1541_s0 = inlined_call_operand.vmem [shape: f32[1,128,10], index: 0, kind: input, shape index: {}]   ;;  %s1542_s1 = inlined_call_operand.vmem [shape: f32[7,5,128], index: 1, kind: input, shape index: {}]   ;;  %s1543_s2 = inlined_call_operand.vmem [shape: f32[5,1], index: 2, kind: input, shape index: {}]   ;;  %s1544_s3 = inlined_call_operand.vmem [shape: f32[1,5,12], index: 3, kind: output, shape index: {}]  }
   0x1   :  { %v33_v0 = vld [vmem:[%s1541_s0 + $0x10] sm:$0xff]  ;;  %v31_v1 = vld [vmem:[%s1541_s0] sm:$0xff]  ;;  %17 = vst.msk [vmem:[#allocation2 + $0x10] sm:$0xff] %vm14_vm0, %v1245_v2  ;;  %15 = vst.msk [vmem:[#allocation2] sm:$0xff] %vm14_vm0, %v1245_v2  ;;  %1062 = vmatprep.subr.bf16.mxu0 %v1246_v3  ;;  %1086 = vmatprep.subr.bf16.mxu1 %v1246_v3  ;;  %vm111_vm2 = vcmask 105496   ;;  %s1251_s5 = smov 126  }
   0x2   :  { %16 = vst.msk [vmem:[#allocation2 + $0x8] sm:$0xff] %vm14_vm0, %v1245_v2  ;;  %18 = vst.msk [vmem:[#allocation2 + $0x18] sm:$0xff] %vm14_vm0, %v1245_v2  ;;  %67 = vrot.lane.b32.xlu1 %v33_v0, %s1247_s16  ;;  %63 = vrot.lane.b32.xlu0 %v31_v1, %s1247_s16  ;;  %v34_v4 = vld [vmem:[%s1541_s0 + $0x18] sm:$0xff]  ;;  %v32_v5 = vld [vmem:[%s1541_s0 + $0x8] sm:$0xff]  ;;  %v1249_v1 = vmov 0   ;;  %s1252_s6 = smov 125  }
   0x3   :  { %19 = vst.msk [vmem:[#allocation2 + $0x20] sm:$0xff] %vm14_vm0, %v1245_v2  ;;  %20 = vst.msk [vmem:[#allocation2 + $0x28] sm:$0xff] %vm14_vm0, %v1245_v2  ;;  %v36_v6 = vld [vmem:[%s1541_s0 + $0x28] sm:$0xff]  ;;  %v35_v7 = vld [vmem:[%s1541_s0 + $0x20] sm:$0xff]  ;;  %849 = vmatprep.mubr.msk.f32.mxu0 %vm1248_vm1, %v1245_v2  ;;  %884 = vmatprep.mubr.msk.f32.mxu1 %vm1248_vm1, %v1245_v2  ;;  %s1253_s8 = smov 124   ;;  %s1254_s9 = smov 123  }
   0x4   :  { %21 = vst.msk [vmem:[#allocation2 + $0x30] sm:$0xff] %vm14_vm0, %v1245_v2  ;;  %22 = vst.msk [vmem:[#allocation2 + $0x38] sm:$0xff] %vm14_vm0, %v1245_v2  ;;  %v38_v8 = vld [vmem:[%s1541_s0 + $0x38] sm:$0xff]  ;;  %v37_v9 = vld [vmem:[%s1541_s0 + $0x30] sm:$0xff]  ;;  %1241 = vset.pattern.permute.xlu1 %v1249_v1  ;;  %1242 = vset.pattern.permute.xlu0 %v1249_v1  ;;  %s1255_s10 = smov 122   ;;  %vm686_vm3 = vcmask 94208  }
   0x5   :  { %23 = vst.msk [vmem:[#allocation2 + $0x40] sm:$0xff] %vm14_vm0, %v1245_v2  ;;  %24 = vst.msk [vmem:[#allocation2 + $0x48] sm:$0xff] %vm14_vm0, %v1245_v2  ;;  %v40_v10 = vld [vmem:[%s1541_s0 + $0x48] sm:$0xff]  ;;  %v39_v11 = vld [vmem:[%s1541_s0 + $0x40] sm:$0xff] }
   0x6   :  { %25 = vst.msk [vmem:[#allocation2 + $0x50] sm:$0xff] %vm14_vm0, %v1245_v2  ;;  %26 = vst.msk [vmem:[#allocation2 + $0x58] sm:$0xff] %vm14_vm0, %v1245_v2  ;;  %69 = vrot.lane.b32.xlu1 %v34_v4, %s1247_s16  ;;  %65 = vrot.lane.b32.xlu0 %v32_v5, %s1247_s16  ;;  %v42_v12 = vld [vmem:[%s1541_s0 + $0x58] sm:$0xff]  ;;  %v41_v13 = vld [vmem:[%s1541_s0 + $0x50] sm:$0xff] }
   0x7   :  { %27 = vst.msk [vmem:[#allocation2 + $0x60] sm:$0xff] %vm14_vm0, %v1245_v2  ;;  %28 = vst.msk [vmem:[#allocation2 + $0x68] sm:$0xff] %vm14_vm0, %v1245_v2  ;;  %v44_v14 = vld [vmem:[%s1541_s0 + $0x68] sm:$0xff]  ;;  %v43_v15 = vld [vmem:[%s1541_s0 + $0x60] sm:$0xff] }
   0x8   :  { %29 = vst.msk [vmem:[#allocation2 + $0x70] sm:$0xff] %vm14_vm0, %v1245_v2  ;;  %30 = vst.msk [vmem:[#allocation2 + $0x78] sm:$0xff] %vm14_vm0, %v1245_v2  ;;  %v46_v16 = vld [vmem:[%s1541_s0 + $0x78] sm:$0xff]  ;;  %v45_v17 = vld [vmem:[%s1541_s0 + $0x70] sm:$0xff] }
   0x9   :  { %v144_v58 = vld [vmem:[%s1542_s1] sm:$0x1f]  ;;  %v692_v59 = vld [vmem:[%s1542_s1 + $0x8] sm:$0x1f]  ;;  %v693_v60 = vld [vmem:[%s1542_s1 + $0x10] sm:$0x1f] }
   0xa   :  { %73 = vrot.lane.b32.xlu1 %v36_v6, %s1247_s16  ;;  %71 = vrot.lane.b32.xlu0 %v35_v7, %s1247_s16  ;;  %v694_v61 = vld [vmem:[%s1542_s1 + $0x18] sm:$0x1f]  ;;  %v695_v62 = vld [vmem:[%s1542_s1 + $0x20] sm:$0x1f] }
   0xb   :  { %v696_v63 = vld [vmem:[%s1542_s1 + $0x28] sm:$0x1f]  ;;  %v697_v0 = vld [vmem:[%s1542_s1 + $0x30] sm:$0x1f] }
   0xe   :  { %77 = vrot.lane.b32.xlu1 %v38_v8, %s1247_s16  ;;  %75 = vrot.lane.b32.xlu0 %v37_v9, %s1247_s16 }
  0x12   :  { %81 = vrot.lane.b32.xlu1 %v40_v10, %s1247_s16  ;;  %79 = vrot.lane.b32.xlu0 %v39_v11, %s1247_s16  ;;  %v678_v10 = vld [vmem:[%s1543_s2] sm:$0x1f] }
  0x16   :  { %85 = vrot.lane.b32.xlu1 %v42_v12, %s1247_s16  ;;  %83 = vrot.lane.b32.xlu0 %v41_v13, %s1247_s16 }
  0x1a   :  { %89 = vrot.lane.b32.xlu1 %v44_v14, %s1247_s16  ;;  %87 = vrot.lane.b32.xlu0 %v43_v15, %s1247_s16 }
  0x1e   :  { %93 = vrot.lane.b32.xlu1 %v46_v16, %s1247_s16  ;;  %91 = vrot.lane.b32.xlu0 %v45_v17, %s1247_s16 }
  0x74   :  { %v68_v18 = vpop.permute.xlu1 %67  ;;  %v64_v19 = vpop.permute.xlu0 %63 }
  0x75   :  { %114 = vst.msk [vmem:[#allocation2 + $0x10] sm:$0xff] %vm111_vm2, %v68_v18  ;;  %112 = vst.msk [vmem:[#allocation2] sm:$0xff] %vm111_vm2, %v64_v19 }
  0x78   :  { %v70_v20 = vpop.permute.xlu1 %69  ;;  %v66_v21 = vpop.permute.xlu0 %65 }
  0x79   :  { %115 = vst.msk [vmem:[#allocation2 + $0x18] sm:$0xff] %vm111_vm2, %v70_v20  ;;  %113 = vst.msk [vmem:[#allocation2 + $0x8] sm:$0xff] %vm111_vm2, %v66_v21 }
  0x7c   :  { %v74_v22 = vpop.permute.xlu1 %73  ;;  %v72_v23 = vpop.permute.xlu0 %71  ;;  %v128_v24 = vld [vmem:[#allocation2] sm:$0xff]  ;;  %v130_v29 = vld [vmem:[#allocation2 + $0x10] sm:$0xff] }
  0x7d   :  { %117 = vst.msk [vmem:[#allocation2 + $0x28] sm:$0xff] %vm111_vm2, %v74_v22  ;;  %116 = vst.msk [vmem:[#allocation2 + $0x20] sm:$0xff] %vm111_vm2, %v72_v23 }
  0x80   :  { %v129_v25 = vld [vmem:[#allocation2 + $0x8] sm:$0xff]  ;;  %v78_v26 = vpop.permute.xlu1 %77  ;;  %v76_v27 = vpop.permute.xlu0 %75  ;;  %v131_v30 = vld [vmem:[#allocation2 + $0x18] sm:$0xff] }
  0x81   :  { %v1368_v28 = vpack.c.bf16 %v129_v25, %v128_v24  ;;  %119 = vst.msk [vmem:[#allocation2 + $0x38] sm:$0xff] %vm111_vm2, %v78_v26  ;;  %118 = vst.msk [vmem:[#allocation2 + $0x30] sm:$0xff] %vm111_vm2, %v76_v27  ;;  %v1376_v35 = vpack.c.bf16 %v131_v30, %v130_v29 }
  0x83   :  { %1064 = vmatpush3.bf16.msra.mxu0 %v1368_v28  ;;  %1088 = vmatpush3.bf16.msra.mxu1 %v1368_v28 }
  0x84   :  { %1065 = vmatprep.subr.bf16.mxu0 %v1246_v3  ;;  %1089 = vmatprep.subr.bf16.mxu1 %v1246_v3  ;;  %v82_v31 = vpop.permute.xlu1 %81  ;;  %v80_v32 = vpop.permute.xlu0 %79  ;;  %v132_v33 = vld [vmem:[#allocation2 + $0x20] sm:$0xff]  ;;  %v133_v34 = vld [vmem:[#allocation2 + $0x28] sm:$0xff] }
  0x85   :  { %121 = vst.msk [vmem:[#allocation2 + $0x48] sm:$0xff] %vm111_vm2, %v82_v31  ;;  %120 = vst.msk [vmem:[#allocation2 + $0x40] sm:$0xff] %vm111_vm2, %v80_v32  ;;  %v1382_v36 = vpack.c.bf16 %v133_v34, %v132_v33 }
  0x87   :  { %1067 = vmatpush3.bf16.msra.mxu0 %v1376_v35  ;;  %1091 = vmatpush3.bf16.msra.mxu1 %v1376_v35 }
  0x88   :  { %1068 = vmatprep.subr.bf16.mxu0 %v1246_v3  ;;  %1092 = vmatprep.subr.bf16.mxu1 %v1246_v3  ;;  %v86_v37 = vpop.permute.xlu1 %85  ;;  %v84_v38 = vpop.permute.xlu0 %83  ;;  %v134_v39 = vld [vmem:[#allocation2 + $0x30] sm:$0xff]  ;;  %v135_v40 = vld [vmem:[#allocation2 + $0x38] sm:$0xff] }
  0x89   :  { %123 = vst.msk [vmem:[#allocation2 + $0x58] sm:$0xff] %vm111_vm2, %v86_v37  ;;  %122 = vst.msk [vmem:[#allocation2 + $0x50] sm:$0xff] %vm111_vm2, %v84_v38  ;;  %v1390_v41 = vpack.c.bf16 %v135_v40, %v134_v39 }
  0x8b   :  { %1070 = vmatpush3.bf16.msra.mxu0 %v1382_v36  ;;  %1094 = vmatpush3.bf16.msra.mxu1 %v1382_v36 }
  0x8c   :  { %1071 = vmatprep.subr.bf16.mxu0 %v1246_v3  ;;  %1095 = vmatprep.subr.bf16.mxu1 %v1246_v3  ;;  %v90_v42 = vpop.permute.xlu1 %89  ;;  %v88_v43 = vpop.permute.xlu0 %87  ;;  %v136_v44 = vld [vmem:[#allocation2 + $0x40] sm:$0xff]  ;;  %v137_v45 = vld [vmem:[#allocation2 + $0x48] sm:$0xff] }
  0x8d   :  { %125 = vst.msk [vmem:[#allocation2 + $0x68] sm:$0xff] %vm111_vm2, %v90_v42  ;;  %124 = vst.msk [vmem:[#allocation2 + $0x60] sm:$0xff] %vm111_vm2, %v88_v43  ;;  %v1398_v46 = vpack.c.bf16 %v137_v45, %v136_v44 }
  0x8f   :  { %1073 = vmatpush3.bf16.msra.mxu0 %v1390_v41  ;;  %1097 = vmatpush3.bf16.msra.mxu1 %v1390_v41 }
  0x90   :  { %1074 = vmatprep.subr.bf16.mxu0 %v1246_v3  ;;  %1098 = vmatprep.subr.bf16.mxu1 %v1246_v3  ;;  %v94_v47 = vpop.permute.xlu1 %93  ;;  %v92_v48 = vpop.permute.xlu0 %91  ;;  %v138_v49 = vld [vmem:[#allocation2 + $0x50] sm:$0xff]  ;;  %v139_v50 = vld [vmem:[#allocation2 + $0x58] sm:$0xff] }
  0x91   :  { %127 = vst.msk [vmem:[#allocation2 + $0x78] sm:$0xff] %vm111_vm2, %v94_v47  ;;  %126 = vst.msk [vmem:[#allocation2 + $0x70] sm:$0xff] %vm111_vm2, %v92_v48  ;;  %v1406_v51 = vpack.c.bf16 %v139_v50, %v138_v49 }
  0x93   :  { %1076 = vmatpush3.bf16.msra.mxu0 %v1398_v46  ;;  %1100 = vmatpush3.bf16.msra.mxu1 %v1398_v46 }
  0x94   :  { %1077 = vmatprep.subr.bf16.mxu0 %v1246_v3  ;;  %1101 = vmatprep.subr.bf16.mxu1 %v1246_v3  ;;  %v140_v52 = vld [vmem:[#allocation2 + $0x60] sm:$0xff]  ;;  %v141_v53 = vld [vmem:[#allocation2 + $0x68] sm:$0xff] }
  0x95   :  { %v1412_v54 = vpack.c.bf16 %v141_v53, %v140_v52 }
  0x97   :  { %1079 = vmatpush3.bf16.msra.mxu0 %v1406_v51  ;;  %1103 = vmatpush3.bf16.msra.mxu1 %v1406_v51 }
  0x98   :  { %1080 = vmatprep.subr.bf16.mxu0 %v1246_v3  ;;  %1104 = vmatprep.subr.bf16.mxu1 %v1246_v3  ;;  %v142_v55 = vld [vmem:[#allocation2 + $0x70] sm:$0xff]  ;;  %v143_v56 = vld [vmem:[#allocation2 + $0x78] sm:$0xff] }
  0x99   :  { %v1418_v57 = vpack.c.bf16 %v143_v56, %v142_v55 }
  0x9b   :  { %1082 = vmatpush3.bf16.msra.mxu0 %v1412_v54  ;;  %1106 = vmatpush3.bf16.msra.mxu1 %v1412_v54 }
  0x9c   :  { %1083 = vmatprep.subr.bf16.mxu0 %v1246_v3  ;;  %1107 = vmatprep.subr.bf16.mxu1 %v1246_v3 }
  0x9f   :  { %1085 = vmatpush3.bf16.msra.mxu0 %v1418_v57  ;;  %1109 = vmatpush3.bf16.msra.mxu1 %v1418_v57 }
  0xa0   :  { %1110 = vmatprep.subr.bf16.mxu0 %v1246_v3  ;;  %1134 = vmatprep.subr.bf16.mxu1 %v1246_v3 }
  0xa2   :  { %850 = vmatmul.mubr.f32.vlgmr.msra.gmra.mrb[0].mxu0 %v144_v58  ;;  %885 = vmatmul.mubr.f32.vlgmr.msra.gmra.mrb[0].mxu1 %v692_v59 }
  0xa3   :  { %1112 = vmatpush3.bf16.msra.mxu0 %v1368_v28  ;;  %1136 = vmatpush3.bf16.msra.mxu1 %v1368_v28 }
  0xa4   :  { %1113 = vmatprep.subr.bf16.mxu0 %v1246_v3  ;;  %1137 = vmatprep.subr.bf16.mxu1 %v1246_v3 }
  0xa5   :  { %919 = vmatprep.mubr.msk.f32.mxu0 %vm1248_vm1, %v1245_v2  ;;  %954 = vmatprep.mubr.msk.f32.mxu1 %vm1248_vm1, %v1245_v2 }
  0xa7   :  { %1115 = vmatpush3.bf16.msra.mxu0 %v1376_v35  ;;  %1139 = vmatpush3.bf16.msra.mxu1 %v1376_v35 }
  0xa8   :  { %1116 = vmatprep.subr.bf16.mxu0 %v1246_v3  ;;  %1140 = vmatprep.subr.bf16.mxu1 %v1246_v3 }
  0xab   :  { %1118 = vmatpush3.bf16.msra.mxu0 %v1382_v36  ;;  %1142 = vmatpush3.bf16.msra.mxu1 %v1382_v36 }
  0xac   :  { %1119 = vmatprep.subr.bf16.mxu0 %v1246_v3  ;;  %1143 = vmatprep.subr.bf16.mxu1 %v1246_v3 }
  0xaf   :  { %1121 = vmatpush3.bf16.msra.mxu0 %v1390_v41  ;;  %1145 = vmatpush3.bf16.msra.mxu1 %v1390_v41 }
  0xb0   :  { %1122 = vmatprep.subr.bf16.mxu0 %v1246_v3  ;;  %1146 = vmatprep.subr.bf16.mxu1 %v1246_v3 }
  0xb3   :  { %1124 = vmatpush3.bf16.msra.mxu0 %v1398_v46  ;;  %1148 = vmatpush3.bf16.msra.mxu1 %v1398_v46 }
  0xb4   :  { %1125 = vmatprep.subr.bf16.mxu0 %v1246_v3  ;;  %1149 = vmatprep.subr.bf16.mxu1 %v1246_v3 }
  0xb7   :  { %1127 = vmatpush3.bf16.msra.mxu0 %v1406_v51  ;;  %1151 = vmatpush3.bf16.msra.mxu1 %v1406_v51 }
  0xb8   :  { %1128 = vmatprep.subr.bf16.mxu0 %v1246_v3  ;;  %1152 = vmatprep.subr.bf16.mxu1 %v1246_v3 }
  0xbb   :  { %1130 = vmatpush3.bf16.msra.mxu0 %v1412_v54  ;;  %1154 = vmatpush3.bf16.msra.mxu1 %v1412_v54 }
  0xbc   :  { %1131 = vmatprep.subr.bf16.mxu0 %v1246_v3  ;;  %1155 = vmatprep.subr.bf16.mxu1 %v1246_v3 }
  0xbf   :  { %1133 = vmatpush3.bf16.msra.mxu0 %v1418_v57  ;;  %1157 = vmatpush3.bf16.msra.mxu1 %v1418_v57 }
  0xc0   :  { %1158 = vmatprep.subr.bf16.mxu0 %v1246_v3  ;;  %1182 = vmatprep.subr.bf16.mxu1 %v1246_v3 }
  0xc2   :  { %920 = vmatmul.mubr.f32.vlgmr.msra.gmra.mrb[2].mxu0 %v693_v60  ;;  %955 = vmatmul.mubr.f32.vlgmr.msra.gmra.mrb[2].mxu1 %v694_v61 }
  0xc3   :  { %1160 = vmatpush3.bf16.msra.mxu0 %v1368_v28  ;;  %1184 = vmatpush3.bf16.msra.mxu1 %v1368_v28 }
  0xc4   :  { %1161 = vmatprep.subr.bf16.mxu0 %v1246_v3  ;;  %1185 = vmatprep.subr.bf16.mxu1 %v1246_v3 }
  0xc5   :  { %989 = vmatprep.mubr.msk.f32.mxu0 %vm1248_vm1, %v1245_v2  ;;  %1024 = vmatprep.mubr.msk.f32.mxu1 %vm1248_vm1, %v1245_v2 }
  0xc7   :  { %1163 = vmatpush3.bf16.msra.mxu0 %v1376_v35  ;;  %1187 = vmatpush3.bf16.msra.mxu1 %v1376_v35 }
  0xc8   :  { %1164 = vmatprep.subr.bf16.mxu0 %v1246_v3  ;;  %1188 = vmatprep.subr.bf16.mxu1 %v1246_v3 }
  0xcb   :  { %1166 = vmatpush3.bf16.msra.mxu0 %v1382_v36  ;;  %1190 = vmatpush3.bf16.msra.mxu1 %v1382_v36 }
  0xcc   :  { %1167 = vmatprep.subr.bf16.mxu0 %v1246_v3  ;;  %1191 = vmatprep.subr.bf16.mxu1 %v1246_v3 }
  0xcf   :  { %1169 = vmatpush3.bf16.msra.mxu0 %v1390_v41  ;;  %1193 = vmatpush3.bf16.msra.mxu1 %v1390_v41 }
  0xd0   :  { %1170 = vmatprep.subr.bf16.mxu0 %v1246_v3  ;;  %1194 = vmatprep.subr.bf16.mxu1 %v1246_v3 }
  0xd3   :  { %1172 = vmatpush3.bf16.msra.mxu0 %v1398_v46  ;;  %1196 = vmatpush3.bf16.msra.mxu1 %v1398_v46 }
  0xd4   :  { %1173 = vmatprep.subr.bf16.mxu0 %v1246_v3  ;;  %1197 = vmatprep.subr.bf16.mxu1 %v1246_v3 }
  0xd7   :  { %1175 = vmatpush3.bf16.msra.mxu0 %v1406_v51  ;;  %1199 = vmatpush3.bf16.msra.mxu1 %v1406_v51 }
  0xd8   :  { %1176 = vmatprep.subr.bf16.mxu0 %v1246_v3  ;;  %1200 = vmatprep.subr.bf16.mxu1 %v1246_v3 }
  0xdb   :  { %1178 = vmatpush3.bf16.msra.mxu0 %v1412_v54  ;;  %1202 = vmatpush3.bf16.msra.mxu1 %v1412_v54 }
  0xdc   :  { %1179 = vmatprep.subr.bf16.mxu0 %v1246_v3  ;;  %1203 = vmatprep.subr.bf16.mxu1 %v1246_v3 }
  0xdf   :  { %1181 = vmatpush3.bf16.msra.mxu0 %v1418_v57  ;;  %1205 = vmatpush3.bf16.msra.mxu1 %v1418_v57 }
  0xe0   :  { %1206 = vmatprep.subr.bf16.mxu0 %v1246_v3 }
  0xe2   :  { %990 = vmatmul.mubr.f32.vlgmr.msra.gmra.mrb[4].mxu0 %v695_v62  ;;  %1025 = vmatmul.mubr.f32.vlgmr.msra.gmra.mrb[4].mxu1 %v696_v63 }
  0xe3   :  { %1208 = vmatpush3.bf16.msra.mxu0 %v1368_v28  ;;  %1059 = vmatprep.mubr.msk.f32.mxu0 %vm1248_vm1, %v1245_v2 }
  0xe4   :  { %1209 = vmatprep.subr.bf16.mxu0 %v1246_v3 }
  0xe7   :  { %1211 = vmatpush3.bf16.msra.mxu0 %v1376_v35 }
  0xe8   :  { %1212 = vmatprep.subr.bf16.mxu0 %v1246_v3 }
  0xeb   :  { %1214 = vmatpush3.bf16.msra.mxu0 %v1382_v36 }
  0xec   :  { %1215 = vmatprep.subr.bf16.mxu0 %v1246_v3 }
  0xef   :  { %1217 = vmatpush3.bf16.msra.mxu0 %v1390_v41 }
  0xf0   :  { %1218 = vmatprep.subr.bf16.mxu0 %v1246_v3 }
  0xf3   :  { %1220 = vmatpush3.bf16.msra.mxu0 %v1398_v46 }
  0xf4   :  { %1221 = vmatprep.subr.bf16.mxu0 %v1246_v3 }
  0xf7   :  { %1223 = vmatpush3.bf16.msra.mxu0 %v1406_v51 }
  0xf8   :  { %1224 = vmatprep.subr.bf16.mxu0 %v1246_v3 }
  0xfb   :  { %1226 = vmatpush3.bf16.msra.mxu0 %v1412_v54 }
  0xfc   :  { %1227 = vmatprep.subr.bf16.mxu0 %v1246_v3 }
  0xff   :  { %1229 = vmatpush3.bf16.msra.mxu0 %v1418_v57 }
 0x102   :  { %1060 = vmatmul.mubr.f32.vlgmr.msra.gmra.mrb[6].mxu0 %v697_v0 }
 0x175   :  { %v211_v2 = vpop.f32.mrb[0].mxu0  ;;  %v284_v4 = vpop.f32.mrb[0].mxu1 }
 0x176   :  { %289 = vrot.lane.b32.xlu0 %v284_v4, %s1250_s4  ;;  %v851_v5 = vpop.f32.mrb[1].mxu0  ;;  %v886_v6 = vpop.f32.mrb[1].mxu1 }
 0x195   :  { %v361_v7 = vpop.f32.mrb[2].mxu0  ;;  %v438_v8 = vpop.f32.mrb[2].mxu1 }
 0x196   :  { %366 = vrot.lane.b32.xlu1 %v361_v7, %s1251_s5  ;;  %v921_v3 = vpop.f32.mrb[3].mxu0  ;;  %443 = vrot.lane.b32.xlu0 %v438_v8, %s1252_s6  ;;  %v956_v9 = vpop.f32.mrb[3].mxu1 }
 0x19a   :  { %681 = vperm.xlu1 %1241, %v678_v10  }
 0x1b5   :  { %v515_v11 = vpop.f32.mrb[4].mxu0  ;;  %v592_v12 = vpop.f32.mrb[4].mxu1 }
 0x1b6   :  { %520 = vrot.lane.b32.xlu0 %v515_v11, %s1253_s8  ;;  %v991_v13 = vpop.f32.mrb[5].mxu0  ;;  %597 = vrot.lane.b32.xlu1 %v592_v12, %s1254_s9  ;;  %v1026_v14 = vpop.f32.mrb[5].mxu1 }
 0x1d5   :  { %v669_v15 = vpop.f32.mrb[6].mxu0 }
 0x1d6   :  { %674 = vrot.lane.b32.xlu0 %v669_v15, %s1255_s10  ;;  %v1061_v16 = vpop.f32.mrb[7].mxu0 }
 0x1e8   :  { %v290_v17 = vpop.permute.xlu0 %289 }
 0x1e9   :  { %v292_v19 = vadd.f32 %v290_v17, %v211_v2 }
 0x208   :  { %v367_v18 = vpop.permute.xlu1 %366  ;;  %v444_v20 = vpop.permute.xlu0 %443 }
 0x209   :  { %v369_v21 = vadd.f32 %v367_v18, %v292_v19 }
 0x20b   :  { %v446_v24 = vadd.f32 %v444_v20, %v369_v21 }
 0x219   :  { %v682_v22 = vpop.permute.xlu1 %681 }
 0x228   :  { %v521_v23 = vpop.permute.xlu0 %520  ;;  %v598_v26 = vpop.permute.xlu1 %597 }
 0x229   :  { %v523_v25 = vadd.f32 %v521_v23, %v446_v24 }
 0x22b   :  { %v600_v27 = vadd.f32 %v598_v26, %v523_v25 }
 0x248   :  { %v675_v28 = vpop.permute.xlu0 %674 }
 0x249   :  { %v677_v29 = vadd.f32 %v675_v28, %v600_v27 }
 0x24b   :  { %v684_v30 = vadd.f32 %v682_v22, %v677_v29 }
 0x24d   :  { %1243 = vtanh.f32 %v684_v30 }
 0x257   :  { %v1244_v31 = vpop.eup %1243 }
 0x258   :  { %687 = vst.msk [vmem:[%s1544_s3] sm:$0x1f] %vm686_vm3, %v1244_v31 }

</bundles_post_ra>
